<compile_context>
chip_gen: v7x
topology: tpu7x:2x2x1
jax: 0.10.0
libtpu: 0.0.40
codegen_flags: <defaults>
</compile_context>

<pallas_src>
import functools

import jax
import jax.numpy as jnp
from jax import lax
from jax.experimental import pallas as pl
from jax.experimental.pallas import tpu as pltpu

_LANES = 128
_ROW_ALIGN = 32  # lcm of sublane tiles for f32 (8) / bf16 (16) / int8 (32)


def _round_up(x: int, m: int) -> int:
    return ((x + m - 1) // m) * m


def make_loss_kernel(r: float, p1: float, n: int, block_rows: int):
    """Builds the sublane/lane-dense grid-accumulating loss kernel."""
    inv_denom = 1.0 / float(n * (n + 1) // 2)  # 1 / sum(range(0, n+1))
    r = float(r)
    p1 = float(p1)

    def kernel(fo0_ref, fo1_ref, pv0_ref, out_ref, acc_ref):
        i = pl.program_id(0)

        @pl.when(i == 0)
        def _():
            acc_ref[...] = jnp.zeros_like(acc_ref)

        fo0 = fo0_ref[...]                          # (block_rows, 128) f32
        fo1 = fo1_ref[...]                          # (block_rows, 128) f32
        pv0 = pv0_ref[...].astype(jnp.float32)      # int8 -> f32 (cheap VPU)

        # Arithmetic selection via the one-hot's first column (no vselect).
        sel = fo1 + pv0 * (fo0 - fo1)

        # log -> EUP slot; remaining elementwise work -> VPU.
        # (no epsilon/clamp on log: faithful to the PyTorch original)
        term = jnp.log(sel) - r * (fo0 - p1) ** 2

        # Global flat sample index of each (row, lane) element of this block.
        row = lax.broadcasted_iota(jnp.int32, (block_rows, _LANES), 0)
        lane = lax.broadcasted_iota(jnp.int32, (block_rows, _LANES), 1)
        idx = (i * block_rows + row) * _LANES + lane
        ri = jnp.where(idx < n, idx.astype(jnp.float32) * inv_denom, 0.0)

        # Dense elementwise accumulation; no per-step cross-lane reduce.
        acc_ref[...] += term * ri

        @pl.when(i == pl.num_programs(0) - 1)
        def _():
            total = -jnp.sum(acc_ref[...])          # single XLU reduce at end
            out_ref[...] = jnp.full((1, _LANES), total, jnp.float32)

    return kernel


def loss_pallas(final_out: jax.Array, point_victor: jax.Array,
                r: float, p1: float, *, block_rows: int = 2048) -> jax.Array:
    n = final_out.shape[0]

    # Pack every operand to a sublane/lane-dense (rows_pad, 128) slab.
    rows = _round_up(max(n, 1), _LANES) // _LANES
    block_rows = max(_ROW_ALIGN,
                     min(block_rows, _round_up(rows, _ROW_ALIGN)))
    rows_pad = _round_up(rows, block_rows)
    n_pad = rows_pad * _LANES
    pad = n_pad - n

    fo = final_out.astype(jnp.float32)
    # Pad with 1.0 so log() stays finite; padded lanes get weight ri = 0.
    fo0 = jnp.pad(fo[:, 0], (0, pad),
                  constant_values=1.0).reshape(rows_pad, _LANES)
    fo1 = jnp.pad(fo[:, 1], (0, pad),
                  constant_values=1.0).reshape(rows_pad, _LANES)
    pv0 = jnp.pad(point_victor[:, 0].astype(jnp.int8), (0, pad),
                  constant_values=1).reshape(rows_pad, _LANES)

    grid = (rows_pad // block_rows,)
    kernel = make_loss_kernel(r, p1, n, block_rows)

    # Double-buffered inputs (2x f32 + 1x int8 = 9 B/elem), plus the f32
    # accumulator block and some headroom; clamp to [16, 32] MiB so the limit
    # is valid on v5e/v6e (128 MiB) and v7x (64 MiB) alike.
    block_elems = block_rows * _LANES
    vmem_bytes = 2 * 9 * block_elems + 4 * block_elems + (1 << 20)
    vmem_bytes = min(max(vmem_bytes, 16 << 20), 32 << 20)

    out = pl.pallas_call(
        kernel,
        out_shape=jax.ShapeDtypeStruct((1, _LANES), jnp.float32),
        grid=grid,
        in_specs=[
            pl.BlockSpec((block_rows, _LANES), lambda i: (i, 0)),
            pl.BlockSpec((block_rows, _LANES), lambda i: (i, 0)),
            pl.BlockSpec((block_rows, _LANES), lambda i: (i, 0)),
        ],
        out_specs=pl.BlockSpec((1, _LANES), lambda i: (0, 0)),
        scratch_shapes=[pltpu.VMEM((block_rows, _LANES), jnp.float32)],
        compiler_params=pltpu.CompilerParams(
            dimension_semantics=("arbitrary",),
            vmem_limit_bytes=vmem_bytes),
    )(fo0, fo1, pv0)
    return out[0, 0]


def loss_reference(final_out, point_victor, r, p1):
    """Pure-JAX reference mirroring the PyTorch loop."""
    n = final_out.shape[0]
    denom = n * (n + 1) // 2
    idx = jnp.arange(n, dtype=jnp.float32) / denom
    sel = jnp.where(point_victor[:, 0] > 0.5, final_out[:, 0], final_out[:, 1])
    term = jnp.log(sel) - r * (final_out[:, 0] - p1) ** 2
    return -jnp.sum(term * idx)


def _make_inputs(key, n):
    k1, k2 = jax.random.split(key)
    # final_out: per-sample 2-class probabilities in (0, 1).
    logits = jax.random.normal(k1, (n, 2), dtype=jnp.float32)
    final_out = jax.nn.softmax(logits, axis=-1)
    # point_victor: one-hot rows, [1,0] or [0,1].
    winner = jax.random.bernoulli(k2, 0.5, (n,)).astype(jnp.int32)
    point_victor = jax.nn.one_hot(winner, 2, dtype=jnp.float32)
    return final_out, point_victor


if __name__ == "__main__":
    r, p1 = 0.5, 0.7
    key = jax.random.PRNGKey(0)
    k_small, k_big = jax.random.split(key)

    # Small case matching the module's typical sequence length (one block).
    # Whole call is jitted so the wrapper's pad/slice/reshape fuse with the
    # kernel launch instead of materializing extra HBM passes.
    N = 8
    fo_s, pv_s = _make_inputs(k_small, N)
    loss_small = jax.jit(functools.partial(loss_pallas, r=r, p1=p1))
    out_s = jax.block_until_ready(loss_small(fo_s, pv_s))
    ref_s = loss_reference(fo_s, pv_s, r, p1)
    assert jnp.allclose(out_s, ref_s, rtol=1e-5, atol=1e-5), (out_s, ref_s)

    # Larger case with a small block to exercise the multi-step grid
    # accumulation path (grid = 2 blocks, padded ragged tail).
    N2 = 5000
    fo_b, pv_b = _make_inputs(k_big, N2)
    loss_big = jax.jit(functools.partial(loss_pallas, r=r, p1=p1,
                                         block_rows=32))
    out_b = jax.block_until_ready(loss_big(fo_b, pv_b))
    ref_b = loss_reference(fo_b, pv_b, r, p1)
    assert jnp.allclose(out_b, ref_b, rtol=1e-4, atol=1e-4), (out_b, ref_b)

    print("KERNEL_OK")
</pallas_src>

<mosaic_0001>
module attributes {stable_mosaic.version = 11 : i64} {
  func.func @kernel(%arg0: i32, %arg1: memref<32x128xf32, #tpu.memory_space<vmem>>, %arg2: memref<32x128xf32, #tpu.memory_space<vmem>>, %arg3: memref<32x128xi8, #tpu.memory_space<vmem>>, %arg4: memref<1x128xf32, #tpu.memory_space<vmem>>, %arg5: memref<32x128xf32, #tpu.memory_space<vmem>>) attributes {dimension_semantics = [#tpu.dimension_semantics<arbitrary>], iteration_bounds = array<i64: 1>, scalar_prefetch = 0 : i64, scratch_operands = 1 : i64, tpu.core_type = #tpu.core_type<tc>, window_params = [{transform_indices = @transform_0, window_bounds = array<i64: 32, 128>}, {transform_indices = @transform_1, window_bounds = array<i64: 32, 128>}, {transform_indices = @transform_2, window_bounds = array<i64: 32, 128>}, {pipeline_mode = #tpu.pipeline_mode<synchronous>, transform_indices = @transform_3, window_bounds = array<i64: 1, 128>}]} {
    %c0_i32 = arith.constant 0 : i32
    %0 = arith.cmpi eq, %arg0, %c0_i32 : i32
    %1 = arith.extui %0 : i1 to i32
    %c0_i32_0 = arith.constant 0 : i32
    %2 = arith.cmpi ne, %1, %c0_i32_0 : i32
    scf.if %2 {
      %cst_15 = arith.constant 0.000000e+00 : f32
      %39 = vector.broadcast %cst_15 : f32 to vector<32x128xf32>
      %c0_16 = arith.constant 0 : index
      %c0_17 = arith.constant 0 : index
      %40 = vector.load %arg5[%c0_16, %c0_17] : memref<32x128xf32, #tpu.memory_space<vmem>>, vector<32x128xf32>
      tpu.vector_store %arg5[%c0_16, %c0_17], %39 {strides = array<i32>} : memref<32x128xf32, #tpu.memory_space<vmem>>, vector<32x128xf32>,
    } else {
    }
    %c0 = arith.constant 0 : index
    %c0_1 = arith.constant 0 : index
    %3 = vector.load %arg1[%c0, %c0_1] : memref<32x128xf32, #tpu.memory_space<vmem>>, vector<32x128xf32>
    %c0_2 = arith.constant 0 : index
    %c0_3 = arith.constant 0 : index
    %4 = vector.load %arg2[%c0_2, %c0_3] : memref<32x128xf32, #tpu.memory_space<vmem>>, vector<32x128xf32>
    %c0_4 = arith.constant 0 : index
    %c0_5 = arith.constant 0 : index
    %5 = vector.load %arg3[%c0_4, %c0_5] : memref<32x128xi8, #tpu.memory_space<vmem>>, vector<32x128xi8>
    %6 = arith.sitofp %5 : vector<32x128xi8> to vector<32x128xf32>
    %7 = arith.subf %3, %4 : vector<32x128xf32>
    %8 = arith.mulf %6, %7 : vector<32x128xf32>
    %9 = arith.addf %4, %8 : vector<32x128xf32>
    %10 = math.log %9 : vector<32x128xf32>
    %cst = arith.constant 0.699999988 : f32
    %11 = vector.broadcast %cst : f32 to vector<32x128xf32>
    %12 = arith.subf %3, %11 : vector<32x128xf32>
    %13 = arith.mulf %12, %12 : vector<32x128xf32>
    %cst_6 = arith.constant 5.000000e-01 : f32
    %14 = vector.broadcast %cst_6 : f32 to vector<32x128xf32>
    %15 = arith.mulf %14, %13 : vector<32x128xf32>
    %16 = arith.subf %10, %15 : vector<32x128xf32>
    %17 = tpu.iota {dimensions = array<i32: 0>} : vector<32x128xi32>
    %18 = tpu.iota {dimensions = array<i32: 1>} : vector<32x128xi32>
    %c32_i32 = arith.constant 32 : i32
    %19 = arith.muli %arg0, %c32_i32 : i32
    %20 = vector.broadcast %19 : i32 to vector<32x128xi32>
    %21 = arith.addi %20, %17 : vector<32x128xi32>
    %c128_i32 = arith.constant 128 : i32
    %22 = vector.broadcast %c128_i32 : i32 to vector<32x128xi32>
    %23 = arith.muli %21, %22 : vector<32x128xi32>
    %24 = arith.addi %23, %18 : vector<32x128xi32>
    %c8_i32 = arith.constant 8 : i32
    %25 = vector.broadcast %c8_i32 : i32 to vector<32x128xi32>
    %26 = arith.cmpi slt, %24, %25 : vector<32x128xi32>
    %27 = arith.sitofp %24 : vector<32x128xi32> to vector<32x128xf32>
    %cst_7 = arith.constant 0.027777778 : f32
    %28 = vector.broadcast %cst_7 : f32 to vector<32x128xf32>
    %29 = arith.mulf %27, %28 : vector<32x128xf32>
    %cst_8 = arith.constant 0.000000e+00 : f32
    %30 = vector.broadcast %cst_8 : f32 to vector<32x128xf32>
    %31 = arith.select %26, %29, %30 : vector<32x128xi1>, vector<32x128xf32>
    %c0_9 = arith.constant 0 : index
    %c0_10 = arith.constant 0 : index
    %32 = vector.load %arg5[%c0_9, %c0_10] : memref<32x128xf32, #tpu.memory_space<vmem>>, vector<32x128xf32>
    %33 = arith.mulf %16, %31 : vector<32x128xf32>
    %34 = arith.addf %32, %33 : vector<32x128xf32>
    %c0_11 = arith.constant 0 : index
    %c0_12 = arith.constant 0 : index
    %35 = vector.load %arg5[%c0_11, %c0_12] : memref<32x128xf32, #tpu.memory_space<vmem>>, vector<32x128xf32>
    tpu.vector_store %arg5[%c0_11, %c0_12], %34 {strides = array<i32>} : memref<32x128xf32, #tpu.memory_space<vmem>>, vector<32x128xf32>,
    %c0_i32_13 = arith.constant 0 : i32
    %36 = arith.cmpi eq, %arg0, %c0_i32_13 : i32
    %37 = arith.extui %36 : i1 to i32
    %c0_i32_14 = arith.constant 0 : i32
    %38 = arith.cmpi ne, %37, %c0_i32_14 : i32
    scf.if %38 {
      %c0_15 = arith.constant 0 : index
      %c0_16 = arith.constant 0 : index
      %39 = vector.load %arg5[%c0_15, %c0_16] : memref<32x128xf32, #tpu.memory_space<vmem>>, vector<32x128xf32>
      %40 = vector.shape_cast %39 : vector<32x128xf32> to vector<1x32x128xf32>
      %cst_17 = arith.constant dense<0.000000e+00> : vector<1xf32>
      %41 = vector.multi_reduction <add>, %40, %cst_17 [1, 2] : vector<1x32x128xf32> to vector<1xf32>
      %42 = vector.shape_cast %41 : vector<1xf32> to vector<1x1x1xf32>
      %43 = vector.extract %42[0, 0, 0] : f32 from vector<1x1x1xf32>
      %cst_18 = arith.constant 0.000000e+00 : f32
      %44 = arith.subf %cst_18, %43 : f32
      %45 = vector.broadcast %44 : f32 to vector<1x128xf32>
      %c0_19 = arith.constant 0 : index
      %c0_20 = arith.constant 0 : index
      %46 = vector.load %arg4[%c0_19, %c0_20] : memref<1x128xf32, #tpu.memory_space<vmem>>, vector<1x128xf32>
      tpu.vector_store %arg4[%c0_19, %c0_20], %45 {strides = array<i32>} : memref<1x128xf32, #tpu.memory_space<vmem>>, vector<1x128xf32>,
    } else {
    }
    return
  }
  func.func @transform_0(%arg0: i32) -> (i32, i32) {
    %c0_i32 = arith.constant 0 : i32
    %c0_i32_0 = arith.constant 0 : i32
    return %arg0, %c0_i32 : i32, i32
  }
  func.func @transform_1(%arg0: i32) -> (i32, i32) {
    %c0_i32 = arith.constant 0 : i32
    %c0_i32_0 = arith.constant 0 : i32
    return %arg0, %c0_i32 : i32, i32
  }
  func.func @transform_2(%arg0: i32) -> (i32, i32) {
    %c0_i32 = arith.constant 0 : i32
    %c0_i32_0 = arith.constant 0 : i32
    return %arg0, %c0_i32 : i32, i32
  }
  func.func @transform_3(%arg0: i32) -> (i32, i32) {
    %c0_i32 = arith.constant 0 : i32
    %c0_i32_0 = arith.constant 0 : i32
    %c0_i32_1 = arith.constant 0 : i32
    return %c0_i32, %c0_i32_0 : i32, i32
  }
}

</mosaic_0001>

<bundles_post_ra>
// kernel: loss_pallas.1
= control target key start
LH: loop header
LB: loop body
LE: loop exit
PB: predicated region body
PF: predicated region fallthrough
CT: control target
= control target key end

     0   :  { %v76_v11 = vlaneseq  ;;  %s264_s0 = inlined_call_operand.vmem [shape: f32[32,128], index: 0, kind: input, shape index: {}]   ;;  %s265_s1 = inlined_call_operand.vmem [shape: f32[32,128], index: 1, kind: input, shape index: {}]   ;;  %s266_s2 = inlined_call_operand.vmem [shape: s8[32,128], index: 2, kind: input, shape index: {}]   ;;  %s267_s3 = inlined_call_operand.hbm [shape: f32[1,128], index: 3, kind: output, shape index: {}]  }
   0x1   :  { %v23_v0 = vld [vmem:[%s264_s0] sm:$0xff]  ;;  %v24_v1 = vld [vmem:[%s264_s0 + $0x8] sm:$0xff]  ;;  %v25_v2 = vld [vmem:[%s264_s0 + $0x10] sm:$0xff] }
   0x2   :  { %v26_v3 = vld [vmem:[%s264_s0 + $0x18] sm:$0xff]  ;;  %v27_v4 = vld [vmem:[%s265_s1] sm:$0xff]  ;;  %v28_v5 = vld [vmem:[%s265_s1 + $0x8] sm:$0xff] }
   0x3   :  { %v29_v6 = vld [vmem:[%s265_s1 + $0x10] sm:$0xff]  ;;  %v30_v7 = vld [vmem:[%s265_s1 + $0x18] sm:$0xff]  ;;  %v31_v8 = vld [vmem:[%s266_s2] sm:$0xff]  ;;  %v40_v9 = vsub.f32 %v23_v0, %v27_v4  ;;  %v41_v10 = vsub.f32 %v24_v1, %v28_v5 }
   0x4   :  { %v32_v12 = vunpack.c.0.s8 %v31_v8  ;;  %v33_v13 = vunpack.c.1.s8 %v31_v8  ;;  %v34_v14 = vunpack.c.2.s8 %v31_v8  ;;  %v35_v15 = vunpack.c.3.s8 %v31_v8 }
   0x5   :  { %8 = vsyncpa [#allocation4], 0  ;;  %v42_v16 = vsub.f32 %v25_v2, %v29_v6  ;;  %v43_v17 = vsub.f32 %v26_v3, %v30_v7  ;;  %v77_v22 = vshrl.u32 %v76_v11, 7  ;;  %v82_v34 = vand.u32 127, %v76_v11  ;;  %s204_s0 = smov [#allocation3]  }
   0x6   :  { %v36_v18 = vcvt.s32.f32 %v32_v12  ;;  %v37_v19 = vcvt.s32.f32 %v33_v13  ;;  %v38_v20 = vcvt.s32.f32 %v34_v14  ;;  %v39_v21 = vcvt.s32.f32 %v35_v15  ;;  %s157_s1 = sshll.u32 %s204_s0, 4  ;;  %s158_s1 = int_to_ptr.vmem [resolvable:$true] %s157_s1 }
   0x7   :  { %v78_v31 = vadd.s32 8, %v77_v22  ;;  %v79_v32 = vadd.s32 16, %v77_v22  ;;  %v80_v33 = vadd.s32 24, %v77_v22  ;;  %v89_v35 = vmul.u32 128, %v77_v22  ;;  %s180_s4 = scalar_lea.vmem %s158_s1, 16  ;;  %s184_s5 = scalar_lea.vmem %s158_s1, 32 }
   0x8   :  { %v44_v23 = vmul.f32 %v40_v9, %v36_v18  ;;  %v45_v24 = vmul.f32 %v41_v10, %v37_v19  ;;  %v46_v25 = vmul.f32 %v42_v16, %v38_v20  ;;  %v47_v26 = vmul.f32 %v43_v17, %v39_v21  ;;  %p181_p0 = scmp.ne.s32.totalorder %s158_s1, %s180_s4  ;;  %p185_p1 = scmp.lt.s32.totalorder %s158_s1, %s158_s1 }
   0x9   :  { %v165_v36 = vadd.f32 -0.7, %v23_v0  ;;  %v90_v37 = vmul.u32 128, %v78_v31  ;;  %v91_v38 = vmul.u32 128, %v79_v32  ;;  %v166_v39 = vadd.f32 -0.7, %v24_v1  ;;  %p186_p2 = scmp.lt.s32.totalorder %s184_s5, %s180_s4 }
   0xa   :  { %v48_v27 = vadd.f32 %v44_v23, %v27_v4  ;;  %v49_v28 = vadd.f32 %v45_v24, %v28_v5  ;;  %v50_v29 = vadd.f32 %v46_v25, %v29_v6  ;;  %v51_v30 = vadd.f32 %v47_v26, %v30_v7 }
   0xb   :  { %v92_v40 = vmul.u32 128, %v80_v33  ;;  %v93_v41 = vadd.s32 %v89_v35, %v82_v34  ;;  %v167_v42 = vadd.f32 -0.7, %v25_v2  ;;  %v94_v43 = vadd.s32 %v90_v37, %v82_v34  ;;  %p187_p3 = por %p186_p2, %p185_p1 }
   0xc   :  { %172 = vlog2.f32 %v48_v27  ;;  %v95_v44 = vadd.s32 %v91_v38, %v82_v34  ;;  %v168_v45 = vadd.f32 -0.7, %v26_v3  ;;  %v64_v48 = vmul.f32 %v165_v36, %v165_v36 }
   0xd   :  { %174 = vlog2.f32 %v49_v28  ;;  %v96_v46 = vadd.s32 %v92_v40, %v82_v34  ;;  %v101_v47 = vcvt.s32.f32 %v93_v41  ;;  %v102_v49 = vcvt.s32.f32 %v94_v43  ;;  %p188_p4 = pnand %p187_p3, %p181_p0 }
   0xe   :  { %176 = vlog2.f32 %v50_v29  ;;  %v65_v50 = vmul.f32 %v166_v39, %v166_v39  ;;  %v103_v51 = vcvt.s32.f32 %v95_v44  ;;  %v66_v52 = vmul.f32 %v167_v42, %v167_v42 }
   0xf   :  { %178 = vlog2.f32 %v51_v30  ;;  %v104_v53 = vcvt.s32.f32 %v96_v46  ;;  %v67_v54 = vmul.f32 %v168_v45, %v168_v45  ;;  %v105_v55 = vmul.f32 0.027777778, %v101_v47 }
  0x10   :  { %v68_v56 = vmul.f32 0.5, %v64_v48  ;;  %vm97_vm0 = vcmp.lt.s32.totalorder %v93_v41, 8  ;;  %v106_v57 = vmul.f32 0.027777778, %v102_v49  ;;  %v69_v59 = vmul.f32 0.5, %v65_v50 }
  0x11   :  { %vm98_vm1 = vcmp.lt.s32.totalorder %v94_v43, 8  ;;  %v107_v60 = vmul.f32 0.027777778, %v103_v51  ;;  %v70_v63 = vmul.f32 0.5, %v66_v52  ;;  %vm99_vm2 = vcmp.lt.s32.totalorder %v95_v44, 8 }
  0x12   :  { %v108_v0 = vmul.f32 0.027777778, %v104_v53  ;;  %v71_v3 = vmul.f32 0.5, %v67_v54  ;;  %vm100_vm3 = vcmp.lt.s32.totalorder %v96_v46, 8  ;;  %v109_v4 = vsel %vm97_vm0, %v105_v55, 0.0 }
  0x13   :  { %v110_v8 = vsel %vm98_vm1, %v106_v57, 0.0  ;;  %v111_v11 = vsel %vm99_vm2, %v107_v60, 0.0 }
  0x14   :  { %v112_v13 = vsel %vm100_vm3, %v108_v0, 0.0 }
  0x16   :  { %v173_v58 = vpop.eup %172 }
  0x17   :  { %v175_v61 = vpop.eup %174  ;;  %v53_v62 = vmul.f32 0.6931472, %v173_v58 }
  0x18   :  { %v177_v1 = vpop.eup %176  ;;  %v55_v2 = vmul.f32 0.6931472, %v175_v61 }
  0x19   :  { %v179_v5 = vpop.eup %178  ;;  %v57_v6 = vmul.f32 0.6931472, %v177_v1  ;;  %v72_v7 = vsub.f32 %v53_v62, %v68_v56 }
  0x1a   :  { %v59_v9 = vmul.f32 0.6931472, %v179_v5  ;;  %v73_v10 = vsub.f32 %v55_v2, %v69_v59 }
  0x1b   :  { %v74_v12 = vsub.f32 %v57_v6, %v70_v63  ;;  %v117_v14 = vmul.f32 %v109_v4, %v72_v7 }
  0x1c   :  { %v75_v15 = vsub.f32 %v59_v9, %v71_v3  ;;  %v118_v16 = vmul.f32 %v110_v8, %v73_v10 }
  0x1d   :  { %v119_v17 = vmul.f32 %v111_v11, %v74_v12 }
  0x1e   :  { %v120_v18 = vmul.f32 %v112_v13, %v75_v15  ;;  %v136_v19 = vadd.f32 %v118_v16, %v117_v14 }
  0x20   :  { %v137_v20 = vadd.f32 %v136_v19, %v119_v17 }
  0x22   :  { %v138_v21 = vadd.f32 %v137_v20, %v120_v18 }
  0x24   :  { %139 = vadd.xlane.f32.xlu0 %v138_v21 }
  0xb1   :  { %v140_v22 = vpop.xlane.xlu0 %139 }
  0xb2   :  { %v141_v23 = vrot.slane %v140_v22, 4 }
  0xb4   :  { %v142_v24 = vadd.f32 %v141_v23, %v140_v22 }
  0xb6   :  { %v143_v25 = vrot.slane %v142_v24, 2 }
  0xb8   :  { %v144_v26 = vadd.f32 %v143_v25, %v142_v24 }
  0xba   :  { %v145_v27 = vrot.slane %v144_v26, 1 }
  0xbc   :  { %v146_v28 = vadd.f32 %v145_v27, %v144_v26 }
  0xbe   :  { %169 = vpush %v146_v28 }
  0xef   :  { %s170_s2 = spop %169 }
  0xf0   :  { %s148_s30 = ssub.f32 0.0, %s170_s2 }
  0xf2   :  { %v149_v29 = vstv %s148_s30 }
  0xf3   :  { %150 = vst [vmem:[#allocation3] sm:$0x1] %v149_v29 }
  0xf4   :  { %191 = shalt.err (!%p188_p4)
}
  0xf5   :  { %s192_s8 = scalar_lea.hbm %s267_s3, 16 }
  0xf6   :  { %p193_p5 = scmp.ne.s32.totalorder %s267_s3, %s192_s8  ;;  %p196_p6 = scmp.lt.u32.totalorder %s192_s8, %s267_s3 }
  0xf8   :  { %p198_p7 = pnand %p196_p6, %p193_p5 }
  0xfa   :  { %201 = shalt.err (!%p198_p7)
}
  0xfb   :  { %160 = dma.vmem_to_hbm [thread:$0]  %s158_s1, 16, %s267_s3, [#allocation4]  }
  0xfc   :  { %202 = dma.done.wait [#allocation4], 16  }
  0xfd   :  { %203 = vsyncadd [#allocation4], 4294967280 }
  0xfe   :  { %164 = vsyncpa [#allocation4], 1 }

</bundles_post_ra>
